<compile_context>
chip_gen: v7x
topology: tpu7x:2x2x1
jax: 0.10.0
libtpu: 0.0.40
codegen_flags: <defaults>
</compile_context>

<pallas_src>
import functools

import numpy as np

import jax
import jax.numpy as jnp
from jax.experimental import pallas as pl
from jax.experimental.pallas import tpu as pltpu


# ---------------------------------------------------------------------------
# Fused kernel: one grid step == one sample.
#   x_ref    : (S+2, S*4)        zero H-padded input rows, lane layout (w, cin)
#   m1_ref   : (3, S*4,  S*C1)   banded conv1 weights, cols = [even w | odd w]
#   b1_ref   : (1, (S/2)*C1)     conv1 bias tiled over pooled w
#   m2_ref   : (3, (S/2)*C1, (S/2)*C2)  banded conv2 weights
#   b2_ref   : (1, (S/4)*C2)     conv2 bias tiled over pooled w
#   w1_ref   : (S/4, (S/4)*C2, Hh)  MLP1 weights, NCHW flatten folded in
#   bm1_ref  : (1, Hh)
#   w2_ref   : (1, Hh)           MLP2 weights as a row (f32, used on the VPU)
#   bm2_ref  : (1, 1)
#   o_ref    : (1, 1)
#   xpad2_ref: (S/2+2, (S/2)*C1) VMEM scratch, zero H-padded conv2 input
# ---------------------------------------------------------------------------
def _fused_forward_kernel(x_ref, m1_ref, b1_ref, m2_ref, b2_ref,
                          w1_ref, bm1_ref, w2_ref, bm2_ref,
                          o_ref, xpad2_ref, *, S, C1, C2, cdtype):
    Ho1 = S // 2                 # spatial size after first pool (= conv2 input size)
    Ho2 = S // 4                 # spatial size after second pool
    half1 = Ho1 * C1             # pooled conv1 row width, lane layout (wo, c)
    half2 = Ho2 * C2             # pooled conv2 row width

    def conv_relu_pool(read_rows, m_ref, b_row, ho, half):
        # read_rows(start, n): rows [start, start+2, ..., start+2(n-1)] of the
        # zero H-padded input, cast to the MXU dtype.
        acc_e = jnp.zeros((ho, 2 * half), jnp.float32)   # conv rows 2r
        acc_o = jnp.zeros((ho, 2 * half), jnp.float32)   # conv rows 2r+1
        for dh in range(3):
            m = m_ref[dh]
            acc_e = acc_e + jnp.dot(read_rows(dh, ho), m,
                                    preferred_element_type=jnp.float32)
            acc_o = acc_o + jnp.dot(read_rows(dh + 1, ho), m,
                                    preferred_element_type=jnp.float32)
        y = jnp.maximum(acc_e, acc_o)                # 2x2 maxpool over h
        y = jnp.maximum(y[:, :half], y[:, half:])    # 2x2 maxpool over w (even/odd halves)
        return jnp.maximum(y + b_row, 0.0)           # bias + ReLU (commute with max)

    # --- conv1 + ReLU + maxpool -------------------------------------------
    act1 = conv_relu_pool(
        lambda s, n: x_ref[pl.ds(s, n, 2), :].astype(cdtype),
        m1_ref, b1_ref[...], Ho1, half1)             # (Ho1, Ho1*C1)  f32

    # --- conv2 + ReLU + maxpool -------------------------------------------
    # Only the two boundary rows need zeroing; rows 1..Ho1 are fully rewritten.
    zrow = jnp.zeros((1, half1), xpad2_ref.dtype)
    xpad2_ref[0:1, :] = zrow
    xpad2_ref[Ho1 + 1:Ho1 + 2, :] = zrow
    xpad2_ref[1:1 + Ho1, :] = act1
    act2 = conv_relu_pool(
        lambda s, n: xpad2_ref[pl.ds(s, n, 2), :].astype(cdtype),
        m2_ref, b2_ref[...], Ho2, half2)             # (Ho2, Ho2*C2)  f32

    # --- MLP: Linear(F->Hh) + ReLU + Linear(Hh->1) --------------------------
    h = bm1_ref[...]                                 # (1, Hh) f32
    for r in range(Ho2):
        h = h + jnp.dot(act2[r:r + 1, :].astype(cdtype), w1_ref[r],
                        preferred_element_type=jnp.float32)
    h = jnp.maximum(h, 0.0)
    # Final Linear as VPU multiply + lane reduction (avoids a 1-column matmul).
    o_ref[...] = jnp.sum(h * w2_ref[...], axis=-1, keepdims=True) + bm2_ref[...]


# ---------------------------------------------------------------------------
# One-time (host-side) weight preparation.
# ---------------------------------------------------------------------------
def _banded_conv(w_hwio, width):
    """w_hwio: (3,3,ci,co). Returns (3, width*ci, width*co) banded matrices.

    M[dh, wi*ci + c_in, col(w_out, c_out)] = w[dh, wi - w_out + 1, c_in, c_out]
    (zero outside the 3-wide band).  Output columns are permuted so the first
    half holds even w_out and the second half odd w_out, making the 2x2 maxpool
    over w a contiguous lane-half max.
    """
    w = np.asarray(w_hwio, np.float32)
    ci, co = w.shape[2], w.shape[3]
    m = np.zeros((3, width * ci, width * co), np.float32)
    for dh in range(3):
        for wo_ in range(width):
            for dw in range(3):
                wi = wo_ + dw - 1
                if 0 <= wi < width:
                    m[dh, wi * ci:(wi + 1) * ci, wo_ * co:(wo_ + 1) * co] = w[dh, dw]
    perm = np.concatenate([np.arange(width)[0::2], np.arange(width)[1::2]])
    cols = (perm[:, None] * co + np.arange(co)[None, :]).reshape(-1)
    return m[:, :, cols]


def prepare_params(params, image_size, use_bf16=True):
    """Build the kernel-ready parameter set (done once, at init time)."""
    S = image_size
    assert S % 4 == 0, "image_size must be divisible by 4"
    C1 = int(params["b_conv1"].shape[0])
    C2 = int(params["b_conv2"].shape[0])
    Hh = int(params["b_mlp1"].shape[0])
    Wo1 = S // 2
    Ho2 = Wo2 = S // 4
    assert int(params["w_mlp1"].shape[0]) == C2 * Ho2 * Wo2
    cdtype = jnp.bfloat16 if use_bf16 else jnp.float32

    m1 = _banded_conv(params["w_conv1"], S)          # (3, S*4,  S*C1)
    m2 = _banded_conv(params["w_conv2"], Wo1)        # (3, Wo1*C1, Wo1*C2)
    b1row = np.tile(np.asarray(params["b_conv1"], np.float32), Wo1)[None, :]
    b2row = np.tile(np.asarray(params["b_conv2"], np.float32), Wo2)[None, :]

    # Fold PyTorch's NCHW flatten (features.view(B, -1)) into the MLP1 rows so
    # the kernel can consume the NHWC-ordered activation rows directly.
    w1 = np.asarray(params["w_mlp1"], np.float32)    # rows in (c, h, w) order
    w1p = w1.reshape(C2, Ho2, Wo2, Hh).transpose(1, 2, 0, 3).reshape(Ho2, Wo2 * C2, Hh)
    w2row = np.asarray(params["w_mlp2"], np.float32).reshape(1, Hh)
    bm1 = np.asarray(params["b_mlp1"], np.float32)[None, :]
    bm2 = np.asarray(params["b_mlp2"], np.float32).reshape(1, 1)

    return {
        "m1": jnp.asarray(m1, cdtype), "b1": jnp.asarray(b1row),
        "m2": jnp.asarray(m2, cdtype), "b2": jnp.asarray(b2row),
        "w1p": jnp.asarray(w1p, cdtype), "bm1": jnp.asarray(bm1),
        "w2row": jnp.asarray(w2row), "bm2": jnp.asarray(bm2),
    }


# ---------------------------------------------------------------------------
# Forward pass wrapper.
# ---------------------------------------------------------------------------
def bikkle_value_forward(obs_nchw, prep):
    """obs_nchw: (B, 4, S, S) float32 -> value (B, 1)."""
    B, Cin, S, _ = obs_nchw.shape
    C1 = prep["m1"].shape[2] // S
    C2 = prep["m2"].shape[2] // (S // 2)
    Hh = prep["bm1"].shape[1]
    Ho1 = S // 2
    Ho2 = S // 4
    half1 = Ho1 * C1
    half2 = Ho2 * C2
    cdtype = prep["m1"].dtype

    # NCHW -> per-row NHWC layout (B, S, S*Cin), zero H-padding top/bottom.
    x = jnp.transpose(obs_nchw, (0, 2, 3, 1)).reshape(B, S, S * Cin)
    x = jnp.pad(x, ((0, 0), (1, 1), (0, 0)))

    kernel = functools.partial(_fused_forward_kernel,
                               S=S, C1=C1, C2=C2, cdtype=cdtype)

    out = pl.pallas_call(
        kernel,
        grid=(B,),
        in_specs=[
            pl.BlockSpec((None, S + 2, S * Cin), lambda b: (b, 0, 0)),
            pl.BlockSpec((3, S * Cin, S * C1), lambda b: (0, 0, 0)),
            pl.BlockSpec((1, half1), lambda b: (0, 0)),
            pl.BlockSpec((3, Ho1 * C1, Ho1 * C2), lambda b: (0, 0, 0)),
            pl.BlockSpec((1, half2), lambda b: (0, 0)),
            pl.BlockSpec((Ho2, half2, Hh), lambda b: (0, 0, 0)),
            pl.BlockSpec((1, Hh), lambda b: (0, 0)),
            pl.BlockSpec((1, Hh), lambda b: (0, 0)),
            pl.BlockSpec((1, 1), lambda b: (0, 0)),
        ],
        out_specs=pl.BlockSpec((None, 1, 1), lambda b: (b, 0, 0)),
        out_shape=jax.ShapeDtypeStruct((B, 1, 1), jnp.float32),
        scratch_shapes=[pltpu.VMEM((Ho1 + 2, Ho1 * C1), jnp.float32)],
        compiler_params=pltpu.CompilerParams(
            dimension_semantics=("parallel",),
            vmem_limit_bytes=32 * 1024 * 1024,
        ),
    )(x, prep["m1"], prep["b1"], prep["m2"], prep["b2"],
      prep["w1p"], prep["bm1"], prep["w2row"], prep["bm2"])
    return out.reshape(B, 1)


# ---------------------------------------------------------------------------
# Pure-JAX reference (same math, XLA ops) for correctness checks.
# ---------------------------------------------------------------------------
def reference_forward(obs_nchw, params):
    x = jnp.transpose(obs_nchw, (0, 2, 3, 1))

    def conv_block(x, w, b):
        y = jax.lax.conv_general_dilated(
            x, w, (1, 1), "SAME",
            dimension_numbers=("NHWC", "HWIO", "NHWC")) + b
        y = jnp.maximum(y, 0.0)
        return jax.lax.reduce_window(y, -jnp.inf, jax.lax.max,
                                     (1, 2, 2, 1), (1, 2, 2, 1), "VALID")

    x = conv_block(x, params["w_conv1"], params["b_conv1"])
    x = conv_block(x, params["w_conv2"], params["b_conv2"])
    feats = jnp.transpose(x, (0, 3, 1, 2)).reshape(x.shape[0], -1)  # NCHW flatten
    h = jnp.maximum(feats @ params["w_mlp1"] + params["b_mlp1"], 0.0)
    return h @ params["w_mlp2"] + params["b_mlp2"]


# ---------------------------------------------------------------------------
# Deterministic parameter init + smoke test
# ---------------------------------------------------------------------------
def init_params(key, image_size, cnn_channels, mlp_hidden):
    C = cnn_channels
    F = (image_size // 4) * (image_size // 4) * (2 * C)
    ks = jax.random.split(key, 8)
    s = lambda fan_in: 1.0 / jnp.sqrt(fan_in)
    return {
        "w_conv1": jax.random.normal(ks[0], (3, 3, 4, C), jnp.float32) * s(9 * 4),
        "b_conv1": jax.random.normal(ks[1], (C,), jnp.float32) * 0.1,
        "w_conv2": jax.random.normal(ks[2], (3, 3, C, 2 * C), jnp.float32) * s(9 * C),
        "b_conv2": jax.random.normal(ks[3], (2 * C,), jnp.float32) * 0.1,
        "w_mlp1": jax.random.normal(ks[4], (F, mlp_hidden), jnp.float32) * s(F),
        "b_mlp1": jax.random.normal(ks[5], (mlp_hidden,), jnp.float32) * 0.1,
        "w_mlp2": jax.random.normal(ks[6], (mlp_hidden, 1), jnp.float32) * s(mlp_hidden),
        "b_mlp2": jax.random.normal(ks[7], (1,), jnp.float32) * 0.1,
    }


if __name__ == "__main__":
    BATCH, IMG, CNN_C, MLP_H = 2, 16, 8, 32

    key = jax.random.PRNGKey(0)
    k_obs, k_par = jax.random.split(key)
    obs = jax.random.normal(k_obs, (BATCH, 4, IMG, IMG), jnp.float32)  # NCHW, like PyTorch
    params = init_params(k_par, IMG, CNN_C, MLP_H)

    ref = reference_forward(obs, params)
    forward = jax.jit(bikkle_value_forward)

    # f32 MXU path: tight check against the pure-XLA reference.
    prep32 = prepare_params(params, IMG, use_bf16=False)
    out32 = jax.block_until_ready(forward(obs, prep32))
    assert out32.shape == (BATCH, 1)
    assert jnp.allclose(out32, ref, atol=5e-4, rtol=5e-4), (out32, ref)

    # bf16 MXU operands + f32 accumulation: loose check.
    prep16 = prepare_params(params, IMG, use_bf16=True)
    out16 = jax.block_until_ready(forward(obs, prep16))
    assert out16.shape == (BATCH, 1)
    assert jnp.allclose(out16, ref, atol=1e-1, rtol=1e-1), (out16, ref)

    print("KERNEL_OK")
</pallas_src>

<mosaic_0001>
module attributes {stable_mosaic.version = 11 : i64} {
  func.func @_fused_forward_kernel(%arg0: i32, %arg1: memref<1x18x64xf32, #tpu.memory_space<vmem>>, %arg2: memref<3x64x128xf32, #tpu.memory_space<vmem>>, %arg3: memref<1x64xf32, #tpu.memory_space<vmem>>, %arg4: memref<3x64x128xf32, #tpu.memory_space<vmem>>, %arg5: memref<1x64xf32, #tpu.memory_space<vmem>>, %arg6: memref<4x64x32xf32, #tpu.memory_space<vmem>>, %arg7: memref<1x32xf32, #tpu.memory_space<vmem>>, %arg8: memref<1x32xf32, #tpu.memory_space<vmem>>, %arg9: memref<1x1xf32, #tpu.memory_space<vmem>>, %arg10: memref<1x1x1xf32, #tpu.memory_space<vmem>>, %arg11: memref<10x64xf32, #tpu.memory_space<vmem>>) attributes {dimension_semantics = [#tpu.dimension_semantics<parallel>], iteration_bounds = array<i64: 2>, scalar_prefetch = 0 : i64, scratch_operands = 1 : i64, tpu.core_type = #tpu.core_type<tc>, window_params = [{transform_indices = @transform_0, window_bounds = array<i64: 1, 18, 64>}, {pipeline_mode = #tpu.pipeline_mode<synchronous>, transform_indices = @transform_1, window_bounds = array<i64: 3, 64, 128>}, {pipeline_mode = #tpu.pipeline_mode<synchronous>, transform_indices = @transform_2, window_bounds = array<i64: 1, 64>}, {pipeline_mode = #tpu.pipeline_mode<synchronous>, transform_indices = @transform_3, window_bounds = array<i64: 3, 64, 128>}, {pipeline_mode = #tpu.pipeline_mode<synchronous>, transform_indices = @transform_4, window_bounds = array<i64: 1, 64>}, {pipeline_mode = #tpu.pipeline_mode<synchronous>, transform_indices = @transform_5, window_bounds = array<i64: 4, 64, 32>}, {pipeline_mode = #tpu.pipeline_mode<synchronous>, transform_indices = @transform_6, window_bounds = array<i64: 1, 32>}, {pipeline_mode = #tpu.pipeline_mode<synchronous>, transform_indices = @transform_7, window_bounds = array<i64: 1, 32>}, {pipeline_mode = #tpu.pipeline_mode<synchronous>, transform_indices = @transform_8, window_bounds = array<i64: 1, 1>}, {transform_indices = @transform_9, window_bounds = array<i64: 1, 1, 1>}]} {
    %c0 = arith.constant 0 : index
    %c0_0 = arith.constant 0 : index
    %0 = vector.load %arg3[%c0, %c0_0] : memref<1x64xf32, #tpu.memory_space<vmem>>, vector<1x64xf32>
    %cst = arith.constant 0.000000e+00 : f32
    %1 = vector.broadcast %cst : f32 to vector<8x128xf32>
    %cst_1 = arith.constant 0.000000e+00 : f32
    %2 = vector.broadcast %cst_1 : f32 to vector<8x128xf32>
    %c0_2 = arith.constant 0 : index
    %c0_3 = arith.constant 0 : index
    %c0_4 = arith.constant 0 : index
    %3 = vector.load %arg2[%c0_2, %c0_3, %c0_4] : memref<3x64x128xf32, #tpu.memory_space<vmem>>, vector<1x64x128xf32>
    %4 = vector.shape_cast %3 : vector<1x64x128xf32> to vector<64x128xf32>
    %c0_5 = arith.constant 0 : index
    %c0_6 = arith.constant 0 : index
    %c0_7 = arith.constant 0 : index
    %5 = tpu.strided_load %arg1[%c0_5, %c0_6, %c0_7] {strides = array<i32: 1, 2, 1>} : memref<1x18x64xf32, #tpu.memory_space<vmem>>, vector<1x8x64xf32>
    %6 = vector.shape_cast %5 : vector<1x8x64xf32> to vector<8x64xf32>
    %cst_8 = arith.constant dense<0.000000e+00> : vector<8x128xf32>
    %7 = tpu.matmul %6, %4, %cst_8 {dimension_numbers = #tpu.dot_dimension_numbers<[1], [0], [0], [1], [0, 0, 1, 1], [], []>} : vector<8x64xf32>, vector<64x128xf32>, vector<8x128xf32> -> vector<8x128xf32>
    %8 = arith.addf %1, %7 : vector<8x128xf32>
    %c0_9 = arith.constant 0 : index
    %c1 = arith.constant 1 : index
    %c0_10 = arith.constant 0 : index
    %9 = tpu.strided_load %arg1[%c0_9, %c1, %c0_10] {strides = array<i32: 1, 2, 1>} : memref<1x18x64xf32, #tpu.memory_space<vmem>>, vector<1x8x64xf32>
    %10 = vector.shape_cast %9 : vector<1x8x64xf32> to vector<8x64xf32>
    %cst_11 = arith.constant dense<0.000000e+00> : vector<8x128xf32>
    %11 = tpu.matmul %10, %4, %cst_11 {dimension_numbers = #tpu.dot_dimension_numbers<[1], [0], [0], [1], [0, 0, 1, 1], [], []>} : vector<8x64xf32>, vector<64x128xf32>, vector<8x128xf32> -> vector<8x128xf32>
    %12 = arith.addf %2, %11 : vector<8x128xf32>
    %c1_12 = arith.constant 1 : index
    %c0_13 = arith.constant 0 : index
    %c0_14 = arith.constant 0 : index
    %13 = vector.load %arg2[%c1_12, %c0_13, %c0_14] : memref<3x64x128xf32, #tpu.memory_space<vmem>>, vector<1x64x128xf32>
    %14 = vector.shape_cast %13 : vector<1x64x128xf32> to vector<64x128xf32>
    %c0_15 = arith.constant 0 : index
    %c1_16 = arith.constant 1 : index
    %c0_17 = arith.constant 0 : index
    %15 = tpu.strided_load %arg1[%c0_15, %c1_16, %c0_17] {strides = array<i32: 1, 2, 1>} : memref<1x18x64xf32, #tpu.memory_space<vmem>>, vector<1x8x64xf32>
    %16 = vector.shape_cast %15 : vector<1x8x64xf32> to vector<8x64xf32>
    %cst_18 = arith.constant dense<0.000000e+00> : vector<8x128xf32>
    %17 = tpu.matmul %16, %14, %cst_18 {dimension_numbers = #tpu.dot_dimension_numbers<[1], [0], [0], [1], [0, 0, 1, 1], [], []>} : vector<8x64xf32>, vector<64x128xf32>, vector<8x128xf32> -> vector<8x128xf32>
    %18 = arith.addf %8, %17 : vector<8x128xf32>
    %c0_19 = arith.constant 0 : index
    %c2 = arith.constant 2 : index
    %c0_20 = arith.constant 0 : index
    %19 = tpu.strided_load %arg1[%c0_19, %c2, %c0_20] {strides = array<i32: 1, 2, 1>} : memref<1x18x64xf32, #tpu.memory_space<vmem>>, vector<1x8x64xf32>
    %20 = vector.shape_cast %19 : vector<1x8x64xf32> to vector<8x64xf32>
    %cst_21 = arith.constant dense<0.000000e+00> : vector<8x128xf32>
    %21 = tpu.matmul %20, %14, %cst_21 {dimension_numbers = #tpu.dot_dimension_numbers<[1], [0], [0], [1], [0, 0, 1, 1], [], []>} : vector<8x64xf32>, vector<64x128xf32>, vector<8x128xf32> -> vector<8x128xf32>
    %22 = arith.addf %12, %21 : vector<8x128xf32>
    %c2_22 = arith.constant 2 : index
    %c0_23 = arith.constant 0 : index
    %c0_24 = arith.constant 0 : index
    %23 = vector.load %arg2[%c2_22, %c0_23, %c0_24] : memref<3x64x128xf32, #tpu.memory_space<vmem>>, vector<1x64x128xf32>
    %24 = vector.shape_cast %23 : vector<1x64x128xf32> to vector<64x128xf32>
    %c0_25 = arith.constant 0 : index
    %c2_26 = arith.constant 2 : index
    %c0_27 = arith.constant 0 : index
    %25 = tpu.strided_load %arg1[%c0_25, %c2_26, %c0_27] {strides = array<i32: 1, 2, 1>} : memref<1x18x64xf32, #tpu.memory_space<vmem>>, vector<1x8x64xf32>
    %26 = vector.shape_cast %25 : vector<1x8x64xf32> to vector<8x64xf32>
    %cst_28 = arith.constant dense<0.000000e+00> : vector<8x128xf32>
    %27 = tpu.matmul %26, %24, %cst_28 {dimension_numbers = #tpu.dot_dimension_numbers<[1], [0], [0], [1], [0, 0, 1, 1], [], []>} : vector<8x64xf32>, vector<64x128xf32>, vector<8x128xf32> -> vector<8x128xf32>
    %28 = arith.addf %18, %27 : vector<8x128xf32>
    %c0_29 = arith.constant 0 : index
    %c3 = arith.constant 3 : index
    %c0_30 = arith.constant 0 : index
    %29 = tpu.strided_load %arg1[%c0_29, %c3, %c0_30] {strides = array<i32: 1, 2, 1>} : memref<1x18x64xf32, #tpu.memory_space<vmem>>, vector<1x8x64xf32>
    %30 = vector.shape_cast %29 : vector<1x8x64xf32> to vector<8x64xf32>
    %cst_31 = arith.constant dense<0.000000e+00> : vector<8x128xf32>
    %31 = tpu.matmul %30, %24, %cst_31 {dimension_numbers = #tpu.dot_dimension_numbers<[1], [0], [0], [1], [0, 0, 1, 1], [], []>} : vector<8x64xf32>, vector<64x128xf32>, vector<8x128xf32> -> vector<8x128xf32>
    %32 = arith.addf %22, %31 : vector<8x128xf32>
    %33 = arith.maximumf %28, %32 : vector<8x128xf32>
    %34 = vector.extract_strided_slice %33 {offsets = [0, 0], sizes = [8, 64], strides = [1, 1]} : vector<8x128xf32> to vector<8x64xf32>
    %35 = vector.extract_strided_slice %33 {offsets = [0, 64], sizes = [8, 64], strides = [1, 1]} : vector<8x128xf32> to vector<8x64xf32>
    %36 = arith.maximumf %34, %35 : vector<8x64xf32>
    %37 = vector.broadcast %0 : vector<1x64xf32> to vector<8x64xf32>
    %38 = arith.addf %36, %37 : vector<8x64xf32>
    %cst_32 = arith.constant 0.000000e+00 : f32
    %39 = vector.broadcast %cst_32 : f32 to vector<8x64xf32>
    %40 = arith.maximumf %38, %39 : vector<8x64xf32>
    %cst_33 = arith.constant 0.000000e+00 : f32
    %41 = vector.broadcast %cst_33 : f32 to vector<1x64xf32>
    %c0_34 = arith.constant 0 : index
    %c0_35 = arith.constant 0 : index
    %42 = vector.load %arg11[%c0_34, %c0_35] : memref<10x64xf32, #tpu.memory_space<vmem>>, vector<1x64xf32>
    tpu.vector_store %arg11[%c0_34, %c0_35], %41 {strides = array<i32>} : memref<10x64xf32, #tpu.memory_space<vmem>>, vector<1x64xf32>,
    %c9 = arith.constant 9 : index
    %c0_36 = arith.constant 0 : index
    %43 = vector.load %arg11[%c9, %c0_36] : memref<10x64xf32, #tpu.memory_space<vmem>>, vector<1x64xf32>
    tpu.vector_store %arg11[%c9, %c0_36], %41 {strides = array<i32>} : memref<10x64xf32, #tpu.memory_space<vmem>>, vector<1x64xf32>,
    %c1_37 = arith.constant 1 : index
    %c0_38 = arith.constant 0 : index
    %44 = vector.load %arg11[%c1_37, %c0_38] : memref<10x64xf32, #tpu.memory_space<vmem>>, vector<8x64xf32>
    tpu.vector_store %arg11[%c1_37, %c0_38], %40 {strides = array<i32>} : memref<10x64xf32, #tpu.memory_space<vmem>>, vector<8x64xf32>,
    %c0_39 = arith.constant 0 : index
    %c0_40 = arith.constant 0 : index
    %45 = vector.load %arg5[%c0_39, %c0_40] : memref<1x64xf32, #tpu.memory_space<vmem>>, vector<1x64xf32>
    %cst_41 = arith.constant 0.000000e+00 : f32
    %46 = vector.broadcast %cst_41 : f32 to vector<4x128xf32>
    %cst_42 = arith.constant 0.000000e+00 : f32
    %47 = vector.broadcast %cst_42 : f32 to vector<4x128xf32>
    %c0_43 = arith.constant 0 : index
    %c0_44 = arith.constant 0 : index
    %c0_45 = arith.constant 0 : index
    %48 = vector.load %arg4[%c0_43, %c0_44, %c0_45] : memref<3x64x128xf32, #tpu.memory_space<vmem>>, vector<1x64x128xf32>
    %49 = vector.shape_cast %48 : vector<1x64x128xf32> to vector<64x128xf32>
    %c0_46 = arith.constant 0 : index
    %c0_47 = arith.constant 0 : index
    %50 = tpu.strided_load %arg11[%c0_46, %c0_47] {strides = array<i32: 2, 1>} : memref<10x64xf32, #tpu.memory_space<vmem>>, vector<4x64xf32>
    %cst_48 = arith.constant dense<0.000000e+00> : vector<4x128xf32>
    %51 = tpu.matmul %50, %49, %cst_48 {dimension_numbers = #tpu.dot_dimension_numbers<[1], [0], [0], [1], [0, 0, 1, 1], [], []>} : vector<4x64xf32>, vector<64x128xf32>, vector<4x128xf32> -> vector<4x128xf32>
    %52 = arith.addf %46, %51 : vector<4x128xf32>
    %c1_49 = arith.constant 1 : index
    %c0_50 = arith.constant 0 : index
    %53 = tpu.strided_load %arg11[%c1_49, %c0_50] {strides = array<i32: 2, 1>} : memref<10x64xf32, #tpu.memory_space<vmem>>, vector<4x64xf32>
    %cst_51 = arith.constant dense<0.000000e+00> : vector<4x128xf32>
    %54 = tpu.matmul %53, %49, %cst_51 {dimension_numbers = #tpu.dot_dimension_numbers<[1], [0], [0], [1], [0, 0, 1, 1], [], []>} : vector<4x64xf32>, vector<64x128xf32>, vector<4x128xf32> -> vector<4x128xf32>
    %55 = arith.addf %47, %54 : vector<4x128xf32>
    %c1_52 = arith.constant 1 : index
    %c0_53 = arith.constant 0 : index
    %c0_54 = arith.constant 0 : index
    %56 = vector.load %arg4[%c1_52, %c0_53, %c0_54] : memref<3x64x128xf32, #tpu.memory_space<vmem>>, vector<1x64x128xf32>
    %57 = vector.shape_cast %56 : vector<1x64x128xf32> to vector<64x128xf32>
    %c1_55 = arith.constant 1 : index
    %c0_56 = arith.constant 0 : index
    %58 = tpu.strided_load %arg11[%c1_55, %c0_56] {strides = array<i32: 2, 1>} : memref<10x64xf32, #tpu.memory_space<vmem>>, vector<4x64xf32>
    %cst_57 = arith.constant dense<0.000000e+00> : vector<4x128xf32>
    %59 = tpu.matmul %58, %57, %cst_57 {dimension_numbers = #tpu.dot_dimension_numbers<[1], [0], [0], [1], [0, 0, 1, 1], [], []>} : vector<4x64xf32>, vector<64x128xf32>, vector<4x128xf32> -> vector<4x128xf32>
    %60 = arith.addf %52, %59 : vector<4x128xf32>
    %c2_58 = arith.constant 2 : index
    %c0_59 = arith.constant 0 : index
    %61 = tpu.strided_load %arg11[%c2_58, %c0_59] {strides = array<i32: 2, 1>} : memref<10x64xf32, #tpu.memory_space<vmem>>, vector<4x64xf32>
    %cst_60 = arith.constant dense<0.000000e+00> : vector<4x128xf32>
    %62 = tpu.matmul %61, %57, %cst_60 {dimension_numbers = #tpu.dot_dimension_numbers<[1], [0], [0], [1], [0, 0, 1, 1], [], []>} : vector<4x64xf32>, vector<64x128xf32>, vector<4x128xf32> -> vector<4x128xf32>
    %63 = arith.addf %55, %62 : vector<4x128xf32>
    %c2_61 = arith.constant 2 : index
    %c0_62 = arith.constant 0 : index
    %c0_63 = arith.constant 0 : index
    %64 = vector.load %arg4[%c2_61, %c0_62, %c0_63] : memref<3x64x128xf32, #tpu.memory_space<vmem>>, vector<1x64x128xf32>
    %65 = vector.shape_cast %64 : vector<1x64x128xf32> to vector<64x128xf32>
    %c2_64 = arith.constant 2 : index
    %c0_65 = arith.constant 0 : index
    %66 = tpu.strided_load %arg11[%c2_64, %c0_65] {strides = array<i32: 2, 1>} : memref<10x64xf32, #tpu.memory_space<vmem>>, vector<4x64xf32>
    %cst_66 = arith.constant dense<0.000000e+00> : vector<4x128xf32>
    %67 = tpu.matmul %66, %65, %cst_66 {dimension_numbers = #tpu.dot_dimension_numbers<[1], [0], [0], [1], [0, 0, 1, 1], [], []>} : vector<4x64xf32>, vector<64x128xf32>, vector<4x128xf32> -> vector<4x128xf32>
    %68 = arith.addf %60, %67 : vector<4x128xf32>
    %c3_67 = arith.constant 3 : index
    %c0_68 = arith.constant 0 : index
    %69 = tpu.strided_load %arg11[%c3_67, %c0_68] {strides = array<i32: 2, 1>} : memref<10x64xf32, #tpu.memory_space<vmem>>, vector<4x64xf32>
    %cst_69 = arith.constant dense<0.000000e+00> : vector<4x128xf32>
    %70 = tpu.matmul %69, %65, %cst_69 {dimension_numbers = #tpu.dot_dimension_numbers<[1], [0], [0], [1], [0, 0, 1, 1], [], []>} : vector<4x64xf32>, vector<64x128xf32>, vector<4x128xf32> -> vector<4x128xf32>
    %71 = arith.addf %63, %70 : vector<4x128xf32>
    %72 = arith.maximumf %68, %71 : vector<4x128xf32>
    %73 = vector.extract_strided_slice %72 {offsets = [0, 0], sizes = [4, 64], strides = [1, 1]} : vector<4x128xf32> to vector<4x64xf32>
    %74 = vector.extract_strided_slice %72 {offsets = [0, 64], sizes = [4, 64], strides = [1, 1]} : vector<4x128xf32> to vector<4x64xf32>
    %75 = arith.maximumf %73, %74 : vector<4x64xf32>
    %76 = vector.broadcast %45 : vector<1x64xf32> to vector<4x64xf32>
    %77 = arith.addf %75, %76 : vector<4x64xf32>
    %cst_70 = arith.constant 0.000000e+00 : f32
    %78 = vector.broadcast %cst_70 : f32 to vector<4x64xf32>
    %79 = arith.maximumf %77, %78 : vector<4x64xf32>
    %c0_71 = arith.constant 0 : index
    %c0_72 = arith.constant 0 : index
    %80 = vector.load %arg7[%c0_71, %c0_72] : memref<1x32xf32, #tpu.memory_space<vmem>>, vector<1x32xf32>
    %81 = vector.extract_strided_slice %79 {offsets = [0, 0], sizes = [1, 64], strides = [1, 1]} : vector<4x64xf32> to vector<1x64xf32>
    %c0_73 = arith.constant 0 : index
    %c0_74 = arith.constant 0 : index
    %c0_75 = arith.constant 0 : index
    %82 = vector.load %arg6[%c0_73, %c0_74, %c0_75] : memref<4x64x32xf32, #tpu.memory_space<vmem>>, vector<1x64x32xf32>
    %83 = vector.shape_cast %82 : vector<1x64x32xf32> to vector<64x32xf32>
    %cst_76 = arith.constant dense<0.000000e+00> : vector<1x32xf32>
    %84 = tpu.matmul %81, %83, %cst_76 {dimension_numbers = #tpu.dot_dimension_numbers<[1], [0], [0], [1], [0, 0, 1, 1], [], []>} : vector<1x64xf32>, vector<64x32xf32>, vector<1x32xf32> -> vector<1x32xf32>
    %85 = arith.addf %80, %84 : vector<1x32xf32>
    %86 = vector.extract_strided_slice %79 {offsets = [1, 0], sizes = [1, 64], strides = [1, 1]} : vector<4x64xf32> to vector<1x64xf32>
    %c1_77 = arith.constant 1 : index
    %c0_78 = arith.constant 0 : index
    %c0_79 = arith.constant 0 : index
    %87 = vector.load %arg6[%c1_77, %c0_78, %c0_79] : memref<4x64x32xf32, #tpu.memory_space<vmem>>, vector<1x64x32xf32>
    %88 = vector.shape_cast %87 : vector<1x64x32xf32> to vector<64x32xf32>
    %cst_80 = arith.constant dense<0.000000e+00> : vector<1x32xf32>
    %89 = tpu.matmul %86, %88, %cst_80 {dimension_numbers = #tpu.dot_dimension_numbers<[1], [0], [0], [1], [0, 0, 1, 1], [], []>} : vector<1x64xf32>, vector<64x32xf32>, vector<1x32xf32> -> vector<1x32xf32>
    %90 = arith.addf %85, %89 : vector<1x32xf32>
    %91 = vector.extract_strided_slice %79 {offsets = [2, 0], sizes = [1, 64], strides = [1, 1]} : vector<4x64xf32> to vector<1x64xf32>
    %c2_81 = arith.constant 2 : index
    %c0_82 = arith.constant 0 : index
    %c0_83 = arith.constant 0 : index
    %92 = vector.load %arg6[%c2_81, %c0_82, %c0_83] : memref<4x64x32xf32, #tpu.memory_space<vmem>>, vector<1x64x32xf32>
    %93 = vector.shape_cast %92 : vector<1x64x32xf32> to vector<64x32xf32>
    %cst_84 = arith.constant dense<0.000000e+00> : vector<1x32xf32>
    %94 = tpu.matmul %91, %93, %cst_84 {dimension_numbers = #tpu.dot_dimension_numbers<[1], [0], [0], [1], [0, 0, 1, 1], [], []>} : vector<1x64xf32>, vector<64x32xf32>, vector<1x32xf32> -> vector<1x32xf32>
    %95 = arith.addf %90, %94 : vector<1x32xf32>
    %96 = vector.extract_strided_slice %79 {offsets = [3, 0], sizes = [1, 64], strides = [1, 1]} : vector<4x64xf32> to vector<1x64xf32>
    %c3_85 = arith.constant 3 : index
    %c0_86 = arith.constant 0 : index
    %c0_87 = arith.constant 0 : index
    %97 = vector.load %arg6[%c3_85, %c0_86, %c0_87] : memref<4x64x32xf32, #tpu.memory_space<vmem>>, vector<1x64x32xf32>
    %98 = vector.shape_cast %97 : vector<1x64x32xf32> to vector<64x32xf32>
    %cst_88 = arith.constant dense<0.000000e+00> : vector<1x32xf32>
    %99 = tpu.matmul %96, %98, %cst_88 {dimension_numbers = #tpu.dot_dimension_numbers<[1], [0], [0], [1], [0, 0, 1, 1], [], []>} : vector<1x64xf32>, vector<64x32xf32>, vector<1x32xf32> -> vector<1x32xf32>
    %100 = arith.addf %95, %99 : vector<1x32xf32>
    %cst_89 = arith.constant 0.000000e+00 : f32
    %101 = vector.broadcast %cst_89 : f32 to vector<1x32xf32>
    %102 = arith.maximumf %100, %101 : vector<1x32xf32>
    %c0_90 = arith.constant 0 : index
    %c0_91 = arith.constant 0 : index
    %103 = vector.load %arg8[%c0_90, %c0_91] : memref<1x32xf32, #tpu.memory_space<vmem>>, vector<1x32xf32>
    %104 = arith.mulf %102, %103 : vector<1x32xf32>
    %cst_92 = arith.constant dense<0.000000e+00> : vector<1xf32>
    %105 = vector.multi_reduction <add>, %104, %cst_92 [1] : vector<1x32xf32> to vector<1xf32>
    %106 = vector.shape_cast %105 : vector<1xf32> to vector<1x1xf32>
    %c0_93 = arith.constant 0 : index
    %c0_94 = arith.constant 0 : index
    %107 = vector.load %arg9[%c0_93, %c0_94] : memref<1x1xf32, #tpu.memory_space<vmem>>, vector<1x1xf32>
    %108 = arith.addf %106, %107 : vector<1x1xf32>
    %c0_95 = arith.constant 0 : index
    %c0_96 = arith.constant 0 : index
    %c0_97 = arith.constant 0 : index
    %109 = vector.load %arg10[%c0_95, %c0_96, %c0_97] : memref<1x1x1xf32, #tpu.memory_space<vmem>>, vector<1x1x1xf32>
    %110 = vector.shape_cast %109 : vector<1x1x1xf32> to vector<1x1xf32>
    %111 = vector.shape_cast %108 : vector<1x1xf32> to vector<1x1x1xf32>
    tpu.vector_store %arg10[%c0_95, %c0_96, %c0_97], %111 {strides = array<i32>} : memref<1x1x1xf32, #tpu.memory_space<vmem>>, vector<1x1x1xf32>,
    return
  }
  func.func @transform_0(%arg0: i32) -> (i32, i32, i32) {
    %c0_i32 = arith.constant 0 : i32
    %c0_i32_0 = arith.constant 0 : i32
    %c0_i32_1 = arith.constant 0 : i32
    return %arg0, %c0_i32, %c0_i32_0 : i32, i32, i32
  }
  func.func @transform_1(%arg0: i32) -> (i32, i32, i32) {
    %c0_i32 = arith.constant 0 : i32
    %c0_i32_0 = arith.constant 0 : i32
    %c0_i32_1 = arith.constant 0 : i32
    %c0_i32_2 = arith.constant 0 : i32
    return %c0_i32, %c0_i32_0, %c0_i32_1 : i32, i32, i32
  }
  func.func @transform_2(%arg0: i32) -> (i32, i32) {
    %c0_i32 = arith.constant 0 : i32
    %c0_i32_0 = arith.constant 0 : i32
    %c0_i32_1 = arith.constant 0 : i32
    return %c0_i32, %c0_i32_0 : i32, i32
  }
  func.func @transform_3(%arg0: i32) -> (i32, i32, i32) {
    %c0_i32 = arith.constant 0 : i32
    %c0_i32_0 = arith.constant 0 : i32
    %c0_i32_1 = arith.constant 0 : i32
    %c0_i32_2 = arith.constant 0 : i32
    return %c0_i32, %c0_i32_0, %c0_i32_1 : i32, i32, i32
  }
  func.func @transform_4(%arg0: i32) -> (i32, i32) {
    %c0_i32 = arith.constant 0 : i32
    %c0_i32_0 = arith.constant 0 : i32
    %c0_i32_1 = arith.constant 0 : i32
    return %c0_i32, %c0_i32_0 : i32, i32
  }
  func.func @transform_5(%arg0: i32) -> (i32, i32, i32) {
    %c0_i32 = arith.constant 0 : i32
    %c0_i32_0 = arith.constant 0 : i32
    %c0_i32_1 = arith.constant 0 : i32
    %c0_i32_2 = arith.constant 0 : i32
    return %c0_i32, %c0_i32_0, %c0_i32_1 : i32, i32, i32
  }
  func.func @transform_6(%arg0: i32) -> (i32, i32) {
    %c0_i32 = arith.constant 0 : i32
    %c0_i32_0 = arith.constant 0 : i32
    %c0_i32_1 = arith.constant 0 : i32
    return %c0_i32, %c0_i32_0 : i32, i32
  }
  func.func @transform_7(%arg0: i32) -> (i32, i32) {
    %c0_i32 = arith.constant 0 : i32
    %c0_i32_0 = arith.constant 0 : i32
    %c0_i32_1 = arith.constant 0 : i32
    return %c0_i32, %c0_i32_0 : i32, i32
  }
  func.func @transform_8(%arg0: i32) -> (i32, i32) {
    %c0_i32 = arith.constant 0 : i32
    %c0_i32_0 = arith.constant 0 : i32
    %c0_i32_1 = arith.constant 0 : i32
    return %c0_i32, %c0_i32_0 : i32, i32
  }
  func.func @transform_9(%arg0: i32) -> (i32, i32, i32) {
    %c0_i32 = arith.constant 0 : i32
    %c0_i32_0 = arith.constant 0 : i32
    %c0_i32_1 = arith.constant 0 : i32
    return %arg0, %c0_i32, %c0_i32_0 : i32, i32, i32
  }
}

</mosaic_0001>

<bundles_post_ra>
// kernel: bikkle_value_forward.1
= control target key start
LH: loop header
LB: loop body
LE: loop exit
PB: predicated region body
PF: predicated region fallthrough
CT: control target
= control target key end

     0   :  { %s2515_s11 = smov 0   ;;  %s2937_s0 = inlined_call_operand.vmem [shape: f32[2,18,64], index: 0, kind: input, shape index: {}]   ;;  %s2938_s1 = inlined_call_operand.vmem [shape: f32[3,64,128], index: 1, kind: input, shape index: {}]   ;;  %s2939_s2 = inlined_call_operand.vmem [shape: f32[1,64], index: 2, kind: input, shape index: {}]   ;;  %s2940_s3 = inlined_call_operand.vmem [shape: f32[3,64,128], index: 3, kind: input, shape index: {}]   ;;  %s2941_s4 = inlined_call_operand.vmem [shape: f32[1,64], index: 4, kind: input, shape index: {}]   ;;  %s2942_s5 = inlined_call_operand.vmem [shape: f32[4,64,32], index: 5, kind: input, shape index: {}]   ;;  %s2943_s6 = inlined_call_operand.vmem [shape: f32[1,32], index: 6, kind: input, shape index: {}]   ;;  %s2944_s7 = inlined_call_operand.vmem [shape: f32[1,32], index: 7, kind: input, shape index: {}]   ;;  %s2945_s8 = inlined_call_operand.<no memory space> [shape: f32[1,1], index: 8, kind: input, shape index: {}]   ;;  %s2946_s9 = inlined_call_operand.vmem [shape: f32[2,1,1], index: 9, kind: output, shape index: {}]  }
   0x1   :  { %v14_v0 = vstv %s2945_s8 }
   0x2   :  { %15 = vst [vmem:[#allocation3] sm:$0x1] %v14_v0 }
   0x3 LB: > { %s1690_s12 = sadd.s32 4294967295, %s2456_s11   ;;  %p1694_p0 = scmp.ge.s32.totalorder %s2456_s11, 1  ;;  %s2456_s11 = sphi %s2515_s11, %s21_s11  }
   0x4   : > { %p289_p1 = scmp.lt.s32.totalorder %s2456_s11, 3 }
   0x6   : > { %p290_p2 = pnand %p1694_p0, %p289_p1 }
   0x7   : > { %v1697_v1 = vld [vmem:[%s2938_s1 + $0x40] sm:$0xff] (!%p290_p2)  ;;  %v1698_v2 = vld [vmem:[%s2938_s1 + $0x48] sm:$0xff] (!%p290_p2)  ;;  %v1699_v3 = vld [vmem:[%s2938_s1 + $0x50] sm:$0xff] (!%p290_p2)  ;;  %v2458_v4 = vmov (!%p290_p2), 0.0|0.0   ;;  %vm2459_vm0 = vmmov (!%p290_p2), 0   ;;  %v2460_v7 = vmov (!%p290_p2), 0.0  }
   0x8   : > { %293 = sbr.rel (%p290_p2) target bundleno = 1211 (0x4bb), region = 56  ;;  %2223 = vmatprep.subr.bf16.mxu1 (!%p290_p2), %v2458_v4  ;;  %v2533_v5 = vpack.c.bf16 (!%p290_p2), %v1698_v2, %v1697_v1  ;;  %v1700_v6 = vld [vmem:[%s2938_s1 + $0x58] sm:$0xff] (!%p290_p2)  ;;  %1935 = vmatprep.mubr.msk.f32.mxu1 (!%p290_p2), %vm2459_vm0, %v2460_v7  ;;  %p323_p3 = scmp.lt.s32.totalorder (!%p290_p2), %s1690_s12, 1  ;;  %v1710_v9 = vld [vmem:[%s2938_s1 + $0x80] sm:$0xff] (!%p290_p2)  ;;  %v1711_v10 = vld [vmem:[%s2938_s1 + $0x88] sm:$0xff] (!%p290_p2)  ;;  %vm352_vm1 = vcmask (!%p290_p2), 523264  }
   0x9   : > { %2271 = vmatprep.subr.bf16.mxu0 (!%p290_p2), %v2458_v4  ;;  %2011 = vmatprep.mubr.msk.f32.mxu0 (!%p290_p2), %vm2459_vm0, %v2460_v7  ;;  %v2544_v8 = vpack.c.bf16 (!%p290_p2), %v1700_v6, %v1699_v3  ;;  %v1701_v11 = vld [vmem:[%s2938_s1 + $0x60] sm:$0xff] (!%p290_p2)  ;;  %v1702_v12 = vld [vmem:[%s2938_s1 + $0x68] sm:$0xff] (!%p290_p2)  ;;  %v2561_v13 = vpack.c.bf16 (!%p290_p2), %v1711_v10, %v1710_v9  ;;  %v1712_v14 = vld [vmem:[%s2938_s1 + $0x90] sm:$0xff] (!%p290_p2)  ;;  %vm814_vm2 = vcmask (!%p290_p2), 516096   ;;  %vm1635_vm3 = vcmask (!%p290_p2), 253952  }
   0xa   : > { %2225 = vmatpush3.bf16.msra.mxu1 (!%p290_p2), %v2533_v5  ;;  %v1713_v15 = vld [vmem:[%s2938_s1 + $0x98] sm:$0xff] (!%p290_p2)  ;;  %v2230_v17 = vpack.c.bf16 (!%p290_p2), %v1702_v12, %v1701_v11  ;;  %v1714_v18 = vld [vmem:[%s2938_s1 + $0xa0] sm:$0xff] (!%p290_p2)  ;;  %v1715_v19 = vld [vmem:[%s2938_s1 + $0xa8] sm:$0xff] (!%p290_p2)  ;;  %815 = vst.msk [vmem:[#allocation2] sm:$0x1] (!%p290_p2), %vm814_vm2, %v2460_v7  ;;  %vm1641_vm4 = vcmask (!%p290_p2), 0  }
   0xb   : > { %2226 = vmatprep.subr.bf16.mxu1 (!%p290_p2), %v2458_v4  ;;  %2273 = vmatpush3.bf16.msra.mxu0 (!%p290_p2), %v2561_v13  ;;  %v2570_v16 = vpack.c.bf16 (!%p290_p2), %v1713_v15, %v1712_v14  ;;  %v1703_v20 = vld [vmem:[%s2938_s1 + $0x70] sm:$0xff] (!%p290_p2)  ;;  %v1704_v21 = vld [vmem:[%s2938_s1 + $0x78] sm:$0xff] (!%p290_p2)  ;;  %v2589_v22 = vpack.c.bf16 (!%p290_p2), %v1715_v19, %v1714_v18  ;;  %v332_v26 = vld [vmem:[%s2938_s1] sm:$0xff] (!%p290_p2)  ;;  %816 = vst.msk [vmem:[#allocation2 + $0x9] sm:$0x1] (!%p290_p2), %vm814_vm2, %v2460_v7 }
   0xc   : > { %2274 = vmatprep.subr.bf16.mxu0 (!%p290_p2), %v2458_v4  ;;  %v2233_v23 = vpack.c.bf16 (!%p290_p2), %v1704_v21, %v1703_v20  ;;  %v1716_v24 = vld [vmem:[%s2938_s1 + $0xb0] sm:$0xff] (!%p290_p2)  ;;  %v1717_v25 = vld [vmem:[%s2938_s1 + $0xb8] sm:$0xff] (!%p290_p2)  ;;  %v333_v27 = vld [vmem:[%s2938_s1 + $0x8] sm:$0xff] (!%p290_p2) }
   0xd   : > { %v2281_v28 = vpack.c.bf16 (!%p290_p2), %v1717_v25, %v1716_v24  ;;  %v2236_v30 = vpack.c.bf16 (!%p290_p2), %v333_v27, %v332_v26  ;;  %v334_v31 = vld [vmem:[%s2938_s1 + $0x10] sm:$0xff] (!%p290_p2)  ;;  %v335_v32 = vld [vmem:[%s2938_s1 + $0x18] sm:$0xff] (!%p290_p2)  ;;  %v336_v35 = vld [vmem:[%s2938_s1 + $0x20] sm:$0xff] (!%p290_p2) }
   0xe   : > { %2228 = vmatpush3.bf16.msra.mxu1 (!%p290_p2), %v2544_v8  ;;  %v2239_v34 = vpack.c.bf16 (!%p290_p2), %v335_v32, %v334_v31  ;;  %v337_v36 = vld [vmem:[%s2938_s1 + $0x28] sm:$0xff] (!%p290_p2)  ;;  %v338_v38 = vld [vmem:[%s2938_s1 + $0x30] sm:$0xff] (!%p290_p2)  ;;  %v339_v39 = vld [vmem:[%s2938_s1 + $0x38] sm:$0xff] (!%p290_p2) }
   0xf   : > { %s2948_s12 = smov (!%p323_p3, %s1690_s12), 1  ;;  %2229 = vmatprep.subr.bf16.mxu1 %v2458_v4  ;;  %2276 = vmatpush3.bf16.msra.mxu0 %v2570_v16  ;;  %v2242_v37 = vpack.c.bf16 %v337_v36, %v336_v35  ;;  %v2245_v40 = vpack.c.bf16 %v339_v39, %v338_v38  ;;  %v1722_v43 = vld [vmem:[%s2940_s3 + $0x40] sm:$0xff]  ;;  %v1723_v44 = vld [vmem:[%s2940_s3 + $0x48] sm:$0xff]  ;;  %v1724_v51 = vld [vmem:[%s2940_s3 + $0x50] sm:$0xff] }
  0x10   : > { %s2437_s20 = smul.u32 24, %s2948_s12  ;;  %2277 = vmatprep.subr.bf16.mxu0 %v2458_v4  ;;  %v2296_v45 = vpack.c.bf16 %v1723_v44, %v1722_v43  ;;  %v1725_v52 = vld [vmem:[%s2940_s3 + $0x58] sm:$0xff]  ;;  %v1726_v54 = vld [vmem:[%s2940_s3 + $0x60] sm:$0xff]  ;;  %v1727_v55 = vld [vmem:[%s2940_s3 + $0x68] sm:$0xff]  ;;  %s330_s29 = scalar_lea.vmem %s2946_s9, %s2948_s12 }
  0x11   : > { %v2299_v53 = vpack.c.bf16 %v1725_v52, %v1724_v51  ;;  %v2302_v56 = vpack.c.bf16 %v1727_v55, %v1726_v54  ;;  %v1728_v57 = vld [vmem:[%s2940_s3 + $0x70] sm:$0xff]  ;;  %v1729_v58 = vld [vmem:[%s2940_s3 + $0x78] sm:$0xff]  ;;  %v1721_v63 = vld [vmem:[%s2939_s2] ss:$0 sm:$0xff] }
  0x12   : > { %2231 = vmatpush3.bf16.msra.mxu1 %v2230_v17  ;;  %s2602_s27 = scalar_lea.vmem %s2937_s0, %s2437_s20  ;;  %v2305_v59 = vpack.c.bf16 %v1729_v58, %v1728_v57  ;;  %s2461_s20 = smov 64   ;;  %v820_v6 = vld [vmem:[%s2940_s3 + $0x8] sm:$0xff]  ;;  %v821_v9 = vld [vmem:[%s2940_s3 + $0x10] sm:$0xff]  ;;  %v822_v10 = vld [vmem:[%s2940_s3 + $0x18] sm:$0xff] }
  0x13   : > { %2232 = vmatprep.subr.bf16.mxu1 %v2458_v4  ;;  %2279 = vmatpush3.bf16.msra.mxu0 %v2589_v22  ;;  %v1696_v29 = vld [vmem:[%s2602_s27 + $0x1] ss:$2 sm:$0xff]  ;;  %v1707_v33 = vld [vmem:[%s2602_s27 + $0x2] ss:$2 sm:$0xff]  ;;  %v826_v18 = vld [vmem:[%s2940_s3 + $0x38] sm:$0xff] }
  0x14   : > { %2280 = vmatprep.subr.bf16.mxu0 %v2458_v4  ;;  %v340_v41 = vld [vmem:[%s2602_s27] ss:$2 sm:$0xff]  ;;  %v1719_v42 = vld [vmem:[%s2602_s27 + $0x3] ss:$2 sm:$0xff]  ;;  %v1737_v24 = vld [vmem:[%s2940_s3 + $0x98] sm:$0xff] }
  0x15   : > { %v823_v14 = vld [vmem:[%s2940_s3 + $0x20] sm:$0xff]  ;;  %v824_v15 = vld [vmem:[%s2940_s3 + $0x28] sm:$0xff]  ;;  %v1741_v31 = vld [vmem:[%s2940_s3 + $0xb8] sm:$0xff] }
  0x16   : > { %2234 = vmatpush3.bf16.msra.mxu1 %v2233_v23  ;;  %v1734_v20 = vld [vmem:[%s2940_s3 + $0x80] sm:$0xff]  ;;  %v1735_v21 = vld [vmem:[%s2940_s3 + $0x88] sm:$0xff]  ;;  %v1303_v36 = vld [vmem:[%s2942_s5 + $0x10] sm:$0xff] }
  0x17   : > { %2235 = vmatprep.subr.bf16.mxu1 %v2458_v4  ;;  %2282 = vmatpush3.bf16.msra.mxu0 %v2281_v28  ;;  %v1738_v27 = vld [vmem:[%s2940_s3 + $0xa0] sm:$0xff]  ;;  %v1302_v35 = vld [vmem:[%s2942_s5 + $0x8] sm:$0xff]  ;;  %v1304_v38 = vld [vmem:[%s2942_s5 + $0x18] sm:$0xff] }
  0x18   : > { %2295 = vmatprep.subr.bf16.mxu0 %v2458_v4  ;;  %v2371_v39 = vpack.c.bf16 %v1304_v38, %v1303_v36  ;;  %v1307_v43 = vld [vmem:[%s2942_s5 + $0x30] sm:$0xff]  ;;  %v1308_v44 = vld [vmem:[%s2942_s5 + $0x38] sm:$0xff]  ;;  %v1744_v51 = vld [vmem:[%s2941_s4] ss:$0 sm:$0xff] }
  0x19   : > { %1936 = vmatmul.mubr.msk.f32.vlgmr.msra.gmra.mrb[0].mxu1 %vm352_vm1, %v1696_v29  ;;  %v1746_v54 = vld [vmem:[%s2942_s5 + $0x40] sm:$0xff]  ;;  %v1747_v55 = vld [vmem:[%s2942_s5 + $0x48] sm:$0xff] }
  0x1a   : > { %2237 = vmatpush3.bf16.msra.mxu1 %v2236_v30  ;;  %1954 = vmatprep.mubr.msk.f32.mxu1 %vm2459_vm0, %v2460_v7  ;;  %v2380_v57 = vpack.c.bf16 %v1747_v55, %v1746_v54  ;;  %v1633_v36 = vld [vmem:[%s2944_s7] sm:$0x1] }
  0x1b   : > { %2238 = vmatprep.subr.bf16.mxu1 %v2458_v4  ;;  %2012 = vmatmul.mubr.msk.f32.vlgmr.msra.gmra.mrb[0].mxu0 %vm352_vm1, %v1707_v33 }
  0x1c   : > { %2049 = vmatprep.mubr.msk.f32.mxu0 %vm2459_vm0, %v2460_v7  ;;  %2297 = vmatpush3.bf16.msra.mxu0 %v2296_v45 }
  0x1d   : > { %2298 = vmatprep.subr.bf16.mxu0 %v2458_v4 }
  0x1e   : > { %2240 = vmatpush3.bf16.msra.mxu1 %v2239_v34 }
  0x1f   : > { %2241 = vmatprep.subr.bf16.mxu1 %v2458_v4 }
  0x20   : > { %2300 = vmatpush3.bf16.msra.mxu0 %v2299_v53 }
  0x21   : > { %2301 = vmatprep.subr.bf16.mxu0 %v2458_v4 }
  0x22   : > { %2243 = vmatpush3.bf16.msra.mxu1 %v2242_v37 }
  0x23   : > { %2244 = vmatprep.subr.bf16.mxu1 %v2458_v4 }
  0x24   : > { %2303 = vmatpush3.bf16.msra.mxu0 %v2302_v56 }
  0x25   : > { %2304 = vmatprep.subr.bf16.mxu0 %v2458_v4 }
  0x26   : > { %2246 = vmatpush3.bf16.msra.mxu1 %v2245_v40 }
  0x27   : > { %2247 = vmatprep.subr.bf16.mxu1 %v2458_v4 }
  0x28   : > { %2306 = vmatpush3.bf16.msra.mxu0 %v2305_v59 }
  0x29   : > { %1955 = vmatmul.mubr.msk.f32.vlgmr.msra.gmra.mrb[0].mxu1 %vm352_vm1, %v340_v41  ;;  %2307 = vmatprep.subr.bf16.mxu0 %v2458_v4  ;;  %v1306_v41 = vld [vmem:[%s2942_s5 + $0x28] sm:$0xff] }
  0x2a   : > { %2249 = vmatpush3.bf16.msra.mxu1 %v2533_v5  ;;  %1973 = vmatprep.mubr.msk.f32.mxu1 %vm2459_vm0, %v2460_v7  ;;  %v819_v5 = vld [vmem:[%s2940_s3] sm:$0xff] }
  0x2b   : > { %2250 = vmatprep.subr.bf16.mxu1 %v2458_v4 }
  0x2e   : > { %2252 = vmatpush3.bf16.msra.mxu1 %v2544_v8  ;;  %v2308_v8 = vpack.c.bf16 %v820_v6, %v819_v5  ;;  %v1755_v5 = vld [vmem:[%s2942_s5 + $0x80] sm:$0xff]  ;;  %v1756_v6 = vld [vmem:[%s2942_s5 + $0x88] sm:$0xff] }
  0x2f   : > { %2253 = vmatprep.subr.bf16.mxu1 %v2458_v4 }
  0x32   : > { %2255 = vmatpush3.bf16.msra.mxu1 %v2230_v17  ;;  %v825_v17 = vld [vmem:[%s2940_s3 + $0x30] sm:$0xff] }
  0x33   : > { %2256 = vmatprep.subr.bf16.mxu1 %v2458_v4  ;;  %v2317_v19 = vpack.c.bf16 %v826_v18, %v825_v17  ;;  %v1762_v17 = vld [vmem:[%s2942_s5 + $0xb8] sm:$0xff] }
  0x36   : > { %2258 = vmatpush3.bf16.msra.mxu1 %v2233_v23  ;;  %v1736_v23 = vld [vmem:[%s2940_s3 + $0x90] sm:$0xff] }
  0x37   : > { %2259 = vmatprep.subr.bf16.mxu1 %v2458_v4  ;;  %v2347_v26 = vpack.c.bf16 %v1737_v24, %v1736_v23  ;;  %v1766_v23 = vld [vmem:[%s2942_s5 + $0xd0] sm:$0xff]  ;;  %v1767_v24 = vld [vmem:[%s2942_s5 + $0xd8] sm:$0xff] }
  0x39   : > { %1974 = vmatmul.mubr.msk.f32.vlgmr.msra.gmra.mrb[2].mxu1 %vm352_vm1, %v1707_v33 }
  0x3a   : > { %2261 = vmatpush3.bf16.msra.mxu1 %v2236_v30  ;;  %1992 = vmatprep.mubr.msk.f32.mxu1 %vm2459_vm0, %v2460_v7  ;;  %v1740_v30 = vld [vmem:[%s2940_s3 + $0xb0] sm:$0xff] }
  0x3b   : > { %2262 = vmatprep.subr.bf16.mxu1 %v2458_v4  ;;  %v2353_v32 = vpack.c.bf16 %v1741_v31, %v1740_v30 }
  0x3e   : > { %2264 = vmatpush3.bf16.msra.mxu1 %v2239_v34  ;;  %v1301_v34 = vld [vmem:[%s2942_s5] sm:$0xff] }
  0x3f   : > { %2265 = vmatprep.subr.bf16.mxu1 %v2458_v4 }
  0x42   : > { %2267 = vmatpush3.bf16.msra.mxu1 %v2242_v37  ;;  %v2368_v37 = vpack.c.bf16 %v1302_v35, %v1301_v34 }
  0x43   : > { %2268 = vmatprep.subr.bf16.mxu1 %v2458_v4 }
  0x46   : > { %2270 = vmatpush3.bf16.msra.mxu1 %v2245_v40  ;;  %v1305_v40 = vld [vmem:[%s2942_s5 + $0x20] sm:$0xff] }
  0x47   : > { %2283 = vmatprep.subr.bf16.mxu1 %v2458_v4 }
  0x49   : > { %1993 = vmatmul.mubr.msk.f32.vlgmr.msra.gmra.mrb[2].mxu1 %vm352_vm1, %v1696_v29 }
  0x4a   : > { %2285 = vmatpush3.bf16.msra.mxu1 %v2561_v13  ;;  %2030 = vmatprep.mubr.msk.f32.mxu1 %vm2459_vm0, %v2460_v7  ;;  %v2311_v13 = vpack.c.bf16 %v822_v10, %v821_v9  ;;  %v1757_v10 = vld [vmem:[%s2942_s5 + $0x90] sm:$0xff] }
  0x4b   : > { %2286 = vmatprep.subr.bf16.mxu1 %v2458_v4 }
  0x4e   : > { %2288 = vmatpush3.bf16.msra.mxu1 %v2570_v16  ;;  %v2314_v16 = vpack.c.bf16 %v824_v15, %v823_v14  ;;  %v1760_v14 = vld [vmem:[%s2942_s5 + $0xa8] sm:$0xff] }
  0x4f   : > { %2289 = vmatprep.subr.bf16.mxu1 %v2458_v4 }
  0x52   : > { %2291 = vmatpush3.bf16.msra.mxu1 %v2589_v22  ;;  %v2344_v22 = vpack.c.bf16 %v1735_v21, %v1734_v20  ;;  %v1765_v20 = vld [vmem:[%s2942_s5 + $0xc8] sm:$0xff] }
  0x53   : > { %2292 = vmatprep.subr.bf16.mxu1 %v2458_v4 }
  0x56   : > { %2294 = vmatpush3.bf16.msra.mxu1 %v2281_v28  ;;  %v1739_v28 = vld [vmem:[%s2940_s3 + $0xa8] sm:$0xff] }
  0x57   : > { %2319 = vmatprep.subr.bf16.mxu1 %v2458_v4  ;;  %v2350_v29 = vpack.c.bf16 %v1739_v28, %v1738_v27  ;;  %v1769_v27 = vld [vmem:[%s2942_s5 + $0xe8] sm:$0xff] }
  0x59   : > { %2031 = vmatmul.mubr.msk.f32.vlgmr.msra.gmra.mrb[2].mxu1 %vm352_vm1, %v1719_v42  ;;  %v2374_v42 = vpack.c.bf16 %v1306_v41, %v1305_v40 }
  0x5a   : > { %2087 = vmatprep.mubr.msk.f32.mxu1 %vm2459_vm0, %v2460_v7  ;;  %2321 = vmatpush3.bf16.msra.mxu1 %v2296_v45  ;;  %v2377_v45 = vpack.c.bf16 %v1308_v44, %v1307_v43 }
  0x5b   : > { %2322 = vmatprep.subr.bf16.mxu1 %v2458_v4 }
  0x5e   : > { %2324 = vmatpush3.bf16.msra.mxu1 %v2299_v53 }
  0x5f   : > { %2325 = vmatprep.subr.bf16.mxu1 %v2458_v4 }
  0x62   : > { %2327 = vmatpush3.bf16.msra.mxu1 %v2302_v56 }
  0x63   : > { %2328 = vmatprep.subr.bf16.mxu1 %v2458_v4 }
  0x66   : > { %2330 = vmatpush3.bf16.msra.mxu1 %v2305_v59  ;;  %v1748_v59 = vld [vmem:[%s2942_s5 + $0x50] sm:$0xff] }
  0x67   : > { %2331 = vmatprep.subr.bf16.mxu1 %v2458_v4 }
  0xee   : > { %v719_v46 = vpop.f32.mrb[0].mxu0 }
  0xef   : > { %v2013_v47 = vpop.f32.mrb[1].mxu0 }
  0xfc   : > { %v495_v48 = vpop.f32.mrb[0].mxu1 }
  0xfd   : > { %v2415_v49 = vadd.f32 %v719_v46, %v495_v48  ;;  %v1956_v50 = vpop.f32.mrb[1].mxu1 }
 0x12c   : > { %v795_v60 = vpop.f32.mrb[2].mxu1 }
 0x12d   : > { %v800_v61 = vmax.f32 %v2415_v49, %v795_v60  ;;  %v2032_v62 = vpop.f32.mrb[3].mxu1  ;;  %v1749_v60 = vld [vmem:[%s2942_s5 + $0x58] sm:$0xff] }
 0x12e   : > { %v1750_v62 = vld [vmem:[%s2942_s5 + $0x60] sm:$0xff] }
 0x12f   : > { %802 = vrot.lane.b32.xlu0 %v800_v61, %s2461_s20 }
 0x1a1   : > { %v803_v0 = vpop.permute.xlu0 %802 }
 0x1a2   : > { %v805_v1 = vmax.f32 %v800_v61, %v803_v0  ;;  %v2383_v61 = vpack.c.bf16 %v1749_v60, %v1748_v59 }
 0x1a4   : > { %v812_v2 = vadd.f32 %v1721_v63, %v805_v1  ;;  %v1751_v63 = vld [vmem:[%s2942_s5 + $0x68] sm:$0xff]  ;;  %v1752_v1 = vld [vmem:[%s2942_s5 + $0x70] sm:$0xff] }
 0x1a5   : > { %v2386_v0 = vpack.c.bf16 %v1751_v63, %v1750_v62 }
 0x1a6   : > { %v813_v3 = vmax.f32 %v812_v2, 0.0  ;;  %v1753_v2 = vld [vmem:[%s2942_s5 + $0x78] sm:$0xff] }
 0x1a8   : > { %817 = vst.msk [vmem:[#allocation2 + $0x1] sm:$0xff] %vm352_vm1, %v813_v3  ;;  %v2389_v3 = vpack.c.bf16 %v1753_v2, %v1752_v1 }
 0x1af   : > { %v829_v11 = vld [vmem:[#allocation2 + $0x1] ss:$2 sm:$0xf]  ;;  %v986_v12 = vld [vmem:[#allocation2 + $0x2] ss:$2 sm:$0xf] }
 0x1b0   : > { %2050 = vmatmul.mubr.msk.f32.vlgmr.msra.gmra.mrb[2].mxu0 %vm352_vm1, %v829_v11  ;;  %2088 = vmatmul.mubr.msk.f32.vlgmr.msra.gmra.mrb[4].mxu1 %vm352_vm1, %v986_v12  ;;  %v827_v25 = vld [vmem:[#allocation2] ss:$2 sm:$0xf]  ;;  %v1211_v33 = vld [vmem:[#allocation2 + $0x3] ss:$2 sm:$0xf] }
 0x1b1   : > { %2309 = vmatpush3.bf16.msra.mxu0 %v2308_v8  ;;  %2333 = vmatpush3.bf16.msra.mxu1 %v2308_v8  ;;  %v2392_v8 = vpack.c.bf16 %v1756_v6, %v1755_v5 }
 0x1b2   : > { %2310 = vmatprep.subr.bf16.mxu0 %v2458_v4  ;;  %2334 = vmatprep.subr.bf16.mxu1 %v2458_v4 }
 0x1b3   : > { %2068 = vmatprep.mubr.msk.f32.mxu0 %vm2459_vm0, %v2460_v7  ;;  %2106 = vmatprep.mubr.msk.f32.mxu1 %vm2459_vm0, %v2460_v7 }
 0x1b5   : > { %2312 = vmatpush3.bf16.msra.mxu0 %v2311_v13  ;;  %2336 = vmatpush3.bf16.msra.mxu1 %v2311_v13  ;;  %v1759_v13 = vld [vmem:[%s2942_s5 + $0xa0] sm:$0xff] }
 0x1b6   : > { %2313 = vmatprep.subr.bf16.mxu0 %v2458_v4  ;;  %2337 = vmatprep.subr.bf16.mxu1 %v2458_v4  ;;  %v2398_v15 = vpack.c.bf16 %v1760_v14, %v1759_v13 }
 0x1b9   : > { %2315 = vmatpush3.bf16.msra.mxu0 %v2314_v16  ;;  %2339 = vmatpush3.bf16.msra.mxu1 %v2314_v16  ;;  %v1761_v16 = vld [vmem:[%s2942_s5 + $0xb0] sm:$0xff] }
 0x1ba   : > { %2316 = vmatprep.subr.bf16.mxu0 %v2458_v4  ;;  %2340 = vmatprep.subr.bf16.mxu1 %v2458_v4  ;;  %v2401_v18 = vpack.c.bf16 %v1762_v17, %v1761_v16 }
 0x1bd   : > { %2318 = vmatpush3.bf16.msra.mxu0 %v2317_v19  ;;  %2342 = vmatpush3.bf16.msra.mxu1 %v2317_v19  ;;  %v1764_v19 = vld [vmem:[%s2942_s5 + $0xc0] sm:$0xff] }
 0x1be   : > { %2343 = vmatprep.subr.bf16.mxu0 %v2458_v4  ;;  %2355 = vmatprep.subr.bf16.mxu1 %v2458_v4  ;;  %v2404_v21 = vpack.c.bf16 %v1765_v20, %v1764_v19 }
 0x1c0   : > { %2069 = vmatmul.mubr.msk.f32.vlgmr.msra.gmra.mrb[2].mxu0 %vm352_vm1, %v827_v25  ;;  %2107 = vmatmul.mubr.msk.f32.vlgmr.msra.gmra.mrb[4].mxu1 %vm352_vm1, %v829_v11  ;;  %v1758_v11 = vld [vmem:[%s2942_s5 + $0x98] sm:$0xff]  ;;  %v2407_v25 = vpack.c.bf16 %v1767_v24, %v1766_v23 }
 0x1c1   : > { %2345 = vmatpush3.bf16.msra.mxu0 %v2344_v22  ;;  %2357 = vmatpush3.bf16.msra.mxu1 %v2344_v22 }
 0x1c2   : > { %2346 = vmatprep.subr.bf16.mxu0 %v2458_v4  ;;  %2358 = vmatprep.subr.bf16.mxu1 %v2458_v4 }
 0x1c3   : > { %2125 = vmatprep.mubr.msk.f32.mxu0 %vm2459_vm0, %v2460_v7  ;;  %2144 = vmatprep.mubr.msk.f32.mxu1 %vm2459_vm0, %v2460_v7 }
 0x1c5   : > { %2348 = vmatpush3.bf16.msra.mxu0 %v2347_v26  ;;  %2360 = vmatpush3.bf16.msra.mxu1 %v2347_v26  ;;  %v1768_v26 = vld [vmem:[%s2942_s5 + $0xe0] sm:$0xff] }
 0x1c6   : > { %2349 = vmatprep.subr.bf16.mxu0 %v2458_v4  ;;  %2361 = vmatprep.subr.bf16.mxu1 %v2458_v4  ;;  %v2410_v28 = vpack.c.bf16 %v1769_v27, %v1768_v26 }
 0x1c9   : > { %2351 = vmatpush3.bf16.msra.mxu0 %v2350_v29  ;;  %2363 = vmatpush3.bf16.msra.mxu1 %v2350_v29  ;;  %v1770_v29 = vld [vmem:[%s2942_s5 + $0xf0] sm:$0xff] }
 0x1ca   : > { %2352 = vmatprep.subr.bf16.mxu0 %v2458_v4  ;;  %2364 = vmatprep.subr.bf16.mxu1 %v2458_v4 }
 0x1cd   : > { %2354 = vmatpush3.bf16.msra.mxu0 %v2353_v32  ;;  %2366 = vmatpush3.bf16.msra.mxu1 %v2353_v32  ;;  %v1300_v32 = vld [vmem:[%s2943_s6] sm:$0x1] }
 0x1ce   : > { %2367 = vmatprep.subr.bf16.mxu0 %v2458_v4 }
 0x1d0   : > { %2126 = vmatmul.mubr.msk.f32.vlgmr.msra.gmra.mrb[2].mxu0 %vm352_vm1, %v986_v12  ;;  %2145 = vmatmul.mubr.msk.f32.vlgmr.msra.gmra.mrb[4].mxu1 %vm352_vm1, %v1211_v33  ;;  %v2395_v12 = vpack.c.bf16 %v1758_v11, %v1757_v10 }
 0x1d1   : > { %2163 = vmatprep.mubr.msk.f32.mxu0 %vm2459_vm0, %v2460_v7  ;;  %2369 = vmatpush3.bf16.msra.mxu0 %v2368_v37 }
 0x1d2   : > { %2370 = vmatprep.subr.bf16.mxu0 %v2458_v4 }
 0x1d5   : > { %2372 = vmatpush3.bf16.msra.mxu0 %v2371_v39  ;;  %v1639_v39 = vld [vmem:[#allocation3] sm:$0x1] }
 0x1d6   : > { %2373 = vmatprep.subr.bf16.mxu0 %v2458_v4 }
 0x1d9   : > { %2375 = vmatpush3.bf16.msra.mxu0 %v2374_v42 }
 0x1da   : > { %2376 = vmatprep.subr.bf16.mxu0 %v2458_v4 }
 0x1dd   : > { %2378 = vmatpush3.bf16.msra.mxu0 %v2377_v45 }
 0x1de   : > { %2379 = vmatprep.subr.bf16.mxu0 %v2458_v4 }
 0x2a3   : > { %v1205_v46 = vpop.f32.mrb[2].mxu0  ;;  %v1281_v47 = vpop.f32.mrb[4].mxu1 }
 0x2a4   : > { %v1286_v48 = vmax.f32 %v1205_v46, %v1281_v47  ;;  %v2127_v49 = vpop.f32.mrb[3].mxu0  ;;  %v2146_v50 = vpop.f32.mrb[5].mxu1 }
 0x2a6   : > { %1288 = vrot.lane.b32.xlu0 %v1286_v48, %s2461_s20 }
 0x318   : > { %v1289_v52 = vpop.permute.xlu0 %1288 }
 0x319   : > { %v1291_v53 = vmax.f32 %v1286_v48, %v1289_v52 }
 0x31b   : > { %v1298_v56 = vadd.f32 %v1744_v51, %v1291_v53 }
 0x31d   : > { %v2831_v58 = vmax.f32 %v1298_v56, 0.0 }
 0x31f   : > { %2164 = vmatmul.mubr.msk.f32.vlgmr.msra.gmra.mrb[4].mxu0 %vm352_vm1, %v2831_v58  ;;  %v1392_v9 = vrot.slane %v2831_v58, 1  ;;  %v1475_v22 = vrot.slane %v2831_v58, 2  ;;  %v1558_v31 = vrot.slane %v2831_v58, 3 }
 0x320   : > { %2381 = vmatpush3.bf16.msra.mxu0 %v2380_v57  ;;  %2182 = vmatprep.mubr.msk.f32.mxu0 %vm2459_vm0, %v2460_v7 }
 0x321   : > { %2382 = vmatprep.subr.bf16.mxu0 %v2458_v4 }
 0x324   : > { %2384 = vmatpush3.bf16.msra.mxu0 %v2383_v61 }
 0x325   : > { %2385 = vmatprep.subr.bf16.mxu0 %v2458_v4 }
 0x328   : > { %2387 = vmatpush3.bf16.msra.mxu0 %v2386_v0 }
 0x329   : > { %2388 = vmatprep.subr.bf16.mxu0 %v2458_v4 }
 0x32c   : > { %2390 = vmatpush3.bf16.msra.mxu0 %v2389_v3 }
 0x32d   : > { %2391 = vmatprep.subr.bf16.mxu0 %v2458_v4 }
 0x32f   : > { %2183 = vmatmul.mubr.msk.f32.vlgmr.msra.gmra.mrb[4].mxu0 %vm352_vm1, %v1392_v9 }
 0x330   : > { %2393 = vmatpush3.bf16.msra.mxu0 %v2392_v8  ;;  %2201 = vmatprep.mubr.msk.f32.mxu0 %vm2459_vm0, %v2460_v7 }
 0x331   : > { %2394 = vmatprep.subr.bf16.mxu0 %v2458_v4 }
 0x334   : > { %2396 = vmatpush3.bf16.msra.mxu0 %v2395_v12 }
 0x335   : > { %2397 = vmatprep.subr.bf16.mxu0 %v2458_v4 }
 0x338   : > { %2399 = vmatpush3.bf16.msra.mxu0 %v2398_v15 }
 0x339   : > { %2400 = vmatprep.subr.bf16.mxu0 %v2458_v4 }
 0x33c   : > { %2402 = vmatpush3.bf16.msra.mxu0 %v2401_v18 }
 0x33d   : > { %2403 = vmatprep.subr.bf16.mxu0 %v2458_v4 }
 0x33f   : > { %2202 = vmatmul.mubr.msk.f32.vlgmr.msra.gmra.mrb[4].mxu0 %vm352_vm1, %v1475_v22 }
 0x340   : > { %2405 = vmatpush3.bf16.msra.mxu0 %v2404_v21  ;;  %2220 = vmatprep.mubr.msk.f32.mxu0 %vm2459_vm0, %v2460_v7  ;;  %v1771_v7 = vld [vmem:[%s2942_s5 + $0xf8] sm:$0xff] }
 0x341   : > { %2406 = vmatprep.subr.bf16.mxu0 %v2458_v4  ;;  %v2413_v30 = vpack.c.bf16 %v1771_v7, %v1770_v29 }
 0x344   : > { %2408 = vmatpush3.bf16.msra.mxu0 %v2407_v25 }
 0x345   : > { %2409 = vmatprep.subr.bf16.mxu0 %v2458_v4 }
 0x348   : > { %2411 = vmatpush3.bf16.msra.mxu0 %v2410_v28 }
 0x349   : > { %2412 = vmatprep.subr.bf16.mxu0 %v2458_v4 }
 0x34c   : > { %2414 = vmatpush3.bf16.msra.mxu0 %v2413_v30 }
 0x34f   : > { %2221 = vmatmul.mubr.msk.f32.vlgmr.msra.gmra.mrb[4].mxu0 %vm352_vm1, %v1558_v31 }
 0x422   : > { %v1627_v33 = vpop.f32.mrb[4].mxu0 }
 0x423   : > { %v2416_v34 = vadd.f32 %v1627_v33, %v1300_v32  ;;  %v2222_v35 = vpop.f32.mrb[5].mxu0 }
 0x425   : > { %v1632_v37 = vmax.f32 %v2416_v34, 0.0 }
 0x427   : > { %v1634_v38 = vmul.f32 %v1633_v36, %v1632_v37 }
 0x429   : > { %v1636_v4 = vsel %vm1635_vm3, %v1634_v38, 0.0 }
 0x42a   : > { %1637 = vadd.xlane.f32.xlu1 %v1636_v4 }
 0x4b7   : > { %v1638_v40 = vpop.xlane.xlu1 %1637 }
 0x4b8   : > { %v1640_v41 = vadd.f32 %v1639_v39, %v1638_v40 }
 0x4ba   : > { %1642 = vst.msk [vmem:[%s330_s29] sm:$0x1] %vm1641_vm4, %v1640_v41 }
 0x4bb PF: > { %s21_s11 = sadd.s32 1, %s2456_s11  }
 0x4bc   : > { %p18_p4 = scmp.ge.s32.totalorder %s21_s11, 4  }
 0x4be   :  { %20 = sbr.rel (!%p18_p4) target bundleno = 3 (0x3), region = 99 }

</bundles_post_ra>
